<compile_context>
chip_gen: v6e
topology: v6e:2x2x1
jax: 0.10.0
libtpu: 0.0.40
codegen_flags: <defaults>
</compile_context>

<pallas_src>
import jax
import jax.numpy as jnp
from jax.experimental import pallas as pl
from jax.experimental.pallas import tpu as pltpu


def value_net_kernel(x_ref, w1_ref, b1_ref, w2_ref, b2_ref, o_ref):
    # fc1 on the MXU: [TILE_B, S] @ [S, H] -> [TILE_B, H], f32 accumulation.
    h = jnp.dot(x_ref[...], w1_ref[...], preferred_element_type=jnp.float32)
    # bias + ReLU on the VPU (f32).
    h = jnp.maximum(h + b1_ref[...], 0.0)
    # fc2 as VPU multiply + lane reduce (output dim is 1, so an MXU matmul
    # would waste a pass and force a lane-padded [H, 128] weight tile).
    out = jnp.sum(h * w2_ref[...], axis=-1, keepdims=True) + b2_ref[0, 0]
    o_ref[...] = out.astype(o_ref.dtype)


def value_net_forward(x, w1, b1, w2, b2, *, tile_b=1024):
    """Fused ValueNet forward: relu(x @ w1 + b1) @ w2 + b2 -> [B, 1]."""
    B, S = x.shape
    H = w1.shape[1]

    # Sublane-aligned batch tile; pad B so every grid step sees a full block.
    # Weights are tiny and VMEM-resident, so per-step HBM traffic is just the
    # x tile (and the tiny output column).
    tb = min(tile_b, pl.cdiv(B, 8) * 8)
    b_pad = pl.cdiv(B, tb) * tb
    if b_pad != B:
        x = jnp.pad(x, ((0, b_pad - B), (0, 0)))

    b1_row = b1.reshape(1, H)          # broadcast row for the bias add
    w2_row = w2.reshape(1, H)          # lane-dense fc2 weight row
    b2_scalar = b2.reshape(1, 1)       # scalar bias -> SMEM

    grid = (b_pad // tb,)

    # Advisory cost hint for XLA scheduling around the custom call.
    flops = 2 * b_pad * S * H + 3 * b_pad * H
    bytes_accessed = 4 * (b_pad * S + S * H + H + H + 1 + b_pad)
    cost = pl.CostEstimate(flops=flops, transcendentals=0,
                           bytes_accessed=bytes_accessed)

    out = pl.pallas_call(
        value_net_kernel,
        out_shape=jax.ShapeDtypeStruct((b_pad, 1), jnp.float32),
        grid=grid,
        in_specs=[
            # x: tiled along batch, auto double-buffered.
            pl.BlockSpec((tb, S), lambda i: (i, 0)),
            # Weights / biases: constant index_map -> VMEM-resident across grid.
            pl.BlockSpec((S, H), lambda i: (0, 0)),
            pl.BlockSpec((1, H), lambda i: (0, 0)),
            pl.BlockSpec((1, H), lambda i: (0, 0)),
            # Scalar bias lives in SMEM (no padded VMEM tile / extra DMA).
            pl.BlockSpec(memory_space=pltpu.MemorySpace.SMEM),
        ],
        out_specs=pl.BlockSpec((tb, 1), lambda i: (i, 0)),
        compiler_params=pltpu.CompilerParams(
            # Batch axis is embarrassingly parallel -> shard across TCs on v7x.
            dimension_semantics=("parallel",),
            # Explicit scoped-VMEM budget; working set is tiny so this leaves
            # ample headroom on v5e/v6e/v7x.
            vmem_limit_bytes=32 * 1024 * 1024,
        ),
        cost_estimate=cost,
    )(x, w1, b1_row, w2_row, b2_scalar)

    return out[:B]


def init_params(key, state_dim, hidden_dim):
    # Mirrors torch.nn.Linear default init: U(-1/sqrt(fan_in), 1/sqrt(fan_in))
    k1, k2, k3, k4 = jax.random.split(key, 4)
    bound1 = 1.0 / jnp.sqrt(jnp.float32(state_dim))
    bound2 = 1.0 / jnp.sqrt(jnp.float32(hidden_dim))
    w1 = jax.random.uniform(k1, (state_dim, hidden_dim), jnp.float32, -bound1, bound1)
    b1 = jax.random.uniform(k2, (hidden_dim,), jnp.float32, -bound1, bound1)
    w2 = jax.random.uniform(k3, (hidden_dim, 1), jnp.float32, -bound2, bound2)
    b2 = jax.random.uniform(k4, (1,), jnp.float32, -bound2, bound2)
    return w1, b1, w2, b2


def _reference(x, w1, b1, w2, b2):
    return jnp.maximum(x @ w1 + b1, 0.0) @ w2 + b2


if __name__ == "__main__":
    key = jax.random.PRNGKey(0)
    k_x, k_x2, k_x3, k_p = jax.random.split(key, 4)

    state_dim, hidden_dim = 16, 32
    w1, b1, w2, b2 = init_params(k_p, state_dim, hidden_dim)

    # Small batch, single grid step.
    batch = 8
    x = jax.random.normal(k_x, (batch, state_dim), dtype=jnp.float32)
    out = jax.block_until_ready(value_net_forward(x, w1, b1, w2, b2))
    ref = _reference(x, w1, b1, w2, b2)
    assert out.shape == (batch, 1)
    assert jnp.allclose(out, ref, atol=1e-5, rtol=1e-5)

    # Multi-step grid (exercises batch tiling / pipelining) with a batch size
    # that is not a multiple of the tile (exercises padding + final slice).
    batch2 = 22
    x2 = jax.random.normal(k_x2, (batch2, state_dim), dtype=jnp.float32)
    out2 = jax.block_until_ready(value_net_forward(x2, w1, b1, w2, b2, tile_b=8))
    ref2 = _reference(x2, w1, b1, w2, b2)
    assert out2.shape == (batch2, 1)
    assert jnp.allclose(out2, ref2, atol=1e-5, rtol=1e-5)

    # Slightly larger ragged batch with the default tile (single padded step).
    batch3 = 50
    x3 = jax.random.normal(k_x3, (batch3, state_dim), dtype=jnp.float32)
    out3 = jax.block_until_ready(value_net_forward(x3, w1, b1, w2, b2))
    ref3 = _reference(x3, w1, b1, w2, b2)
    assert out3.shape == (batch3, 1)
    assert jnp.allclose(out3, ref3, atol=1e-5, rtol=1e-5)

    # NOTE: at these toy shapes (S=16, H=32) the MXU is <2% utilized and plain
    # XLA fusion is already near-optimal; the batch grid / resident weights are
    # what make this kernel worthwhile at realistic RL batch sizes (1e4-1e6).
    print("KERNEL_OK")
</pallas_src>

<mosaic_0001>
module attributes {stable_mosaic.version = 11 : i64} {
  func.func @value_net_kernel(%arg0: i32, %arg1: memref<8x16xf32, #tpu.memory_space<vmem>>, %arg2: memref<16x32xf32, #tpu.memory_space<vmem>>, %arg3: memref<1x32xf32, #tpu.memory_space<vmem>>, %arg4: memref<1x32xf32, #tpu.memory_space<vmem>>, %arg5: memref<1x1xf32, #tpu.memory_space<smem>>, %arg6: memref<8x1xf32, #tpu.memory_space<vmem>>) attributes {dimension_semantics = [#tpu.dimension_semantics<parallel>], iteration_bounds = array<i64: 1>, scalar_prefetch = 0 : i64, scratch_operands = 0 : i64, tpu.core_type = #tpu.core_type<tc>, window_params = [{transform_indices = @transform_0, window_bounds = array<i64: 8, 16>}, {pipeline_mode = #tpu.pipeline_mode<synchronous>, transform_indices = @transform_1, window_bounds = array<i64: 16, 32>}, {pipeline_mode = #tpu.pipeline_mode<synchronous>, transform_indices = @transform_2, window_bounds = array<i64: 1, 32>}, {pipeline_mode = #tpu.pipeline_mode<synchronous>, transform_indices = @transform_3, window_bounds = array<i64: 1, 32>}, {transform_indices = @transform_4, window_bounds = array<i64: 1, 1>}, {transform_indices = @transform_5, window_bounds = array<i64: 8, 1>}]} {
    %c0 = arith.constant 0 : index
    %c0_0 = arith.constant 0 : index
    %0 = vector.load %arg1[%c0, %c0_0] : memref<8x16xf32, #tpu.memory_space<vmem>>, vector<8x16xf32>
    %c0_1 = arith.constant 0 : index
    %c0_2 = arith.constant 0 : index
    %1 = vector.load %arg2[%c0_1, %c0_2] : memref<16x32xf32, #tpu.memory_space<vmem>>, vector<16x32xf32>
    %cst = arith.constant dense<0.000000e+00> : vector<8x32xf32>
    %2 = tpu.matmul %0, %1, %cst {dimension_numbers = #tpu.dot_dimension_numbers<[1], [0], [0], [1], [0, 0, 1, 1], [], []>} : vector<8x16xf32>, vector<16x32xf32>, vector<8x32xf32> -> vector<8x32xf32>
    %c0_3 = arith.constant 0 : index
    %c0_4 = arith.constant 0 : index
    %3 = vector.load %arg3[%c0_3, %c0_4] : memref<1x32xf32, #tpu.memory_space<vmem>>, vector<1x32xf32>
    %4 = vector.broadcast %3 : vector<1x32xf32> to vector<8x32xf32>
    %5 = arith.addf %2, %4 : vector<8x32xf32>
    %cst_5 = arith.constant 0.000000e+00 : f32
    %6 = vector.broadcast %cst_5 : f32 to vector<8x32xf32>
    %7 = arith.maximumf %5, %6 : vector<8x32xf32>
    %c0_6 = arith.constant 0 : index
    %c0_7 = arith.constant 0 : index
    %8 = vector.load %arg4[%c0_6, %c0_7] : memref<1x32xf32, #tpu.memory_space<vmem>>, vector<1x32xf32>
    %9 = vector.broadcast %8 : vector<1x32xf32> to vector<8x32xf32>
    %10 = arith.mulf %7, %9 : vector<8x32xf32>
    %cst_8 = arith.constant dense<0.000000e+00> : vector<8xf32>
    %11 = vector.multi_reduction <add>, %10, %cst_8 [1] : vector<8x32xf32> to vector<8xf32>
    %12 = vector.shape_cast %11 : vector<8xf32> to vector<8x1xf32>
    %c0_9 = arith.constant 0 : index
    %c0_10 = arith.constant 0 : index
    %13 = memref.load %arg5[%c0_9, %c0_10] : memref<1x1xf32, #tpu.memory_space<smem>>
    %14 = vector.broadcast %13 : f32 to vector<8x1xf32>
    %15 = arith.addf %12, %14 : vector<8x1xf32>
    %c0_11 = arith.constant 0 : index
    %c0_12 = arith.constant 0 : index
    %16 = vector.load %arg6[%c0_11, %c0_12] : memref<8x1xf32, #tpu.memory_space<vmem>>, vector<8x1xf32>
    tpu.vector_store %arg6[%c0_11, %c0_12], %15 {strides = array<i32>} : memref<8x1xf32, #tpu.memory_space<vmem>>, vector<8x1xf32>,
    return
  }
  func.func @transform_0(%arg0: i32) -> (i32, i32) {
    %c0_i32 = arith.constant 0 : i32
    %c0_i32_0 = arith.constant 0 : i32
    return %arg0, %c0_i32 : i32, i32
  }
  func.func @transform_1(%arg0: i32) -> (i32, i32) {
    %c0_i32 = arith.constant 0 : i32
    %c0_i32_0 = arith.constant 0 : i32
    %c0_i32_1 = arith.constant 0 : i32
    return %c0_i32, %c0_i32_0 : i32, i32
  }
  func.func @transform_2(%arg0: i32) -> (i32, i32) {
    %c0_i32 = arith.constant 0 : i32
    %c0_i32_0 = arith.constant 0 : i32
    %c0_i32_1 = arith.constant 0 : i32
    return %c0_i32, %c0_i32_0 : i32, i32
  }
  func.func @transform_3(%arg0: i32) -> (i32, i32) {
    %c0_i32 = arith.constant 0 : i32
    %c0_i32_0 = arith.constant 0 : i32
    %c0_i32_1 = arith.constant 0 : i32
    return %c0_i32, %c0_i32_0 : i32, i32
  }
  func.func @transform_4(%arg0: i32) -> (i32, i32) {
    %c0_i32 = arith.constant 0 : i32
    %c0_i32_0 = arith.constant 0 : i32
    %c0_i32_1 = arith.constant 0 : i32
    return %c0_i32, %c0_i32_0 : i32, i32
  }
  func.func @transform_5(%arg0: i32) -> (i32, i32) {
    %c0_i32 = arith.constant 0 : i32
    %c0_i32_0 = arith.constant 0 : i32
    return %arg0, %c0_i32 : i32, i32
  }
}

</mosaic_0001>

<bundles_post_ra>
// kernel: tpu_custom_call.1
= control target key start
LH: loop header
LB: loop body
LE: loop exit
PB: predicated region body
PF: predicated region fallthrough
CT: control target
= control target key end

     0   :  { %11 = vsyncpa [#allocation4], 0  ;;  %s272_s0 = inlined_call_operand.hbm [shape: f32[8,16], index: 0, kind: input, shape index: {}]   ;;  %s273_s1 = inlined_call_operand.hbm [shape: f32[16,32], index: 1, kind: input, shape index: {}]   ;;  %s274_s2 = inlined_call_operand.vmem [shape: f32[1,32], index: 2, kind: input, shape index: {}]   ;;  %s275_s3 = inlined_call_operand.vmem [shape: f32[1,32], index: 3, kind: input, shape index: {}]   ;;  %s276_s4 = inlined_call_operand.<no memory space> [shape: f32[1,1], index: 4, kind: input, shape index: {}]   ;;  %s277_s5 = inlined_call_operand.vmem [shape: f32[8,1], index: 5, kind: output, shape index: {}]  }
   0x1   :  { %12 = vsyncpa [#allocation6], 0  ;;  %s218_s18 = smov [#allocation3]   ;;  %s219_s20 = smov [#allocation5]  }
   0x2   :  { %s19_s19 = sshll.u32 %s218_s18, 4  ;;  %s28_s21 = sshll.u32 %s219_s20, 4  ;;  %s20_s19 = int_to_ptr.vmem [resolvable:$true] %s19_s19  ;;  %s29_s21 = int_to_ptr.vmem [resolvable:$true] %s28_s21 }
   0x3   :  { %s182_s22 = scalar_lea.vmem %s20_s19, 128  ;;  %p187_p1 = scmp.lt.s32.totalorder %s20_s19, %s20_s19 }
   0x4   :  { %p183_p0 = scmp.ne.s32.totalorder %s20_s19, %s182_s22  ;;  %p188_p2 = scmp.lt.s32.totalorder %s182_s22, %s182_s22 }
   0x6   :  { %p189_p3 = por %p188_p2, %p187_p1 }
   0x8   :  { %p190_p4 = pnand %p189_p3, %p183_p0 }
   0xa   :  { %193 = shalt.err (!%p190_p4)
}
   0xb   :  { %22 = dma.hbm_to_vmem [thread:$0]  %s272_s0, 128, %s20_s19, [#allocation4]  }
   0xc   :  { %s202_s25 = scalar_lea.vmem %s29_s21, 256  ;;  %p207_p6 = scmp.lt.s32.totalorder %s29_s21, %s29_s21 }
   0xd   :  { %p203_p5 = scmp.ne.s32.totalorder %s29_s21, %s202_s25  ;;  %p208_p7 = scmp.lt.s32.totalorder %s202_s25, %s202_s25 }
   0xf   :  { %p209_p8 = por %p208_p7, %p207_p6 }
  0x11   :  { %p210_p9 = pnand %p209_p8, %p203_p5 }
  0x13   :  { %213 = shalt.err (!%p210_p9)
}
  0x14   :  { %s220_s26 = smov 128   ;;  %s221_s27 = smov 8  }
  0x15   :  { %34 = dma.hbm_to_vmem [thread:$0]  %s273_s1, 256, %s29_s21, [#allocation6], %s220_s26, %s220_s26, %s221_s27  }
  0x16   :  { %214 = dma.done.wait [#allocation4], 128  }
  0x17   :  { %215 = vsyncadd [#allocation4], 4294967168 }
  0x18   :  { %216 = dma.done.wait [#allocation6], 256  }
  0x19   :  { %217 = vsyncadd [#allocation6], 4294967040  ;;  %v222_v0 = vmov 0.0   ;;  %vm223_vm0 = vmmov 0   ;;  %v49_v1 = vld [vmem:[#allocation5 + $0x8] sm:$0xff]  ;;  %v48_v2 = vld [vmem:[#allocation5] sm:$0xff]  ;;  %v145_v12 = vstv %s276_s4 }
  0x1a   :  { %161 = vmatprep.subr.mxu0 %v222_v0  ;;  %165 = vmatprep.mubr.msk.f32.mxu0 %vm223_vm0, %v222_v0  ;;  %v47_v3 = vld [vmem:[#allocation3] sm:$0xff]  ;;  %vm57_vm1 = vcmask 130048   ;;  %vm140_vm2 = vcmask 261120   ;;  %vm147_vm3 = vcmask 7168  }
  0x1b   :  { %162 = vmatpush3.msra.mxu0 %v49_v1  ;;  %v155_v4 = vld [vmem:[%s274_s2] ss:$0 sm:$0xff] }
  0x1c   :  { %163 = vmatprep.subr.mxu0 %v222_v0  ;;  %v157_v8 = vld [vmem:[%s275_s3] ss:$0 sm:$0xff] }
  0x1d   :  { %164 = vmatpush3.msra.mxu0 %v48_v2 }
  0x1e   :  { %166 = vmatmul.mubr.msk.f32.vlgmr.msra.gmra.mxu0 %vm57_vm1, %v47_v3 }
  0xde   :  { %v127_v5 = vpop.f32.mrf.mxu0 }
  0xdf   :  { %v128_v6 = vadd.f32 %v155_v4, %v127_v5 }
  0xe0   :  { %v167_v7 = vpop.f32.mrf.mxu0 }
  0xe1   :  { %v131_v9 = vmax.f32 %v128_v6, 0.0 }
  0xe3   :  { %v139_v10 = vmul.f32 %v157_v8, %v131_v9 }
  0xe5   :  { %v141_v11 = vsel %vm140_vm2, %v139_v10, 0.0 }
  0xe6   :  { %142 = vadd.xlane.f32.xlu0 %v141_v11 }
 0x16f   :  { %v143_v13 = vpop.xlane.xlu0 %142 }
 0x170   :  { %v146_v14 = vadd.f32 %v145_v12, %v143_v13 }
 0x172   :  { %148 = vst.msk [vmem:[%s277_s5] sm:$0xff] %vm147_vm3, %v146_v14 }
 0x173   :  { %153 = vsyncpa [#allocation4], 1 }
 0x174   :  { %154 = vsyncpa [#allocation6], 1 }

</bundles_post_ra>
